<compile_context>
chip_gen: v7x
topology: tpu7x:2x2x1
jax: 0.10.0
libtpu: 0.0.40
codegen_flags: <defaults>
</compile_context>

<pallas_src>
import functools

import jax
import jax.numpy as jnp
from jax import lax
from jax.experimental import pallas as pl
from jax.experimental.pallas import tpu as pltpu

_VMEM_LIMIT = 32 * 1024 * 1024          # safe on all gens incl. v7x (64 MiB / TC)


# ----------------------------------------------------------------------------
# small helpers
# ----------------------------------------------------------------------------
def _silu(x):
    return x * jax.nn.sigmoid(x)


def _round_up(x, m):
    return ((x + m - 1) // m) * m


def _row_tile(R, cap=16384):
    """Row tile for the pointwise kernels: >= ~1-2 MB per grid step, multiple of 128."""
    rp0 = _round_up(R, 128)
    steps = max(1, -(-rp0 // cap))
    tile = _round_up(-(-rp0 // steps), 128)
    return tile, tile * steps


def _choose_spatial_tile(H, W, C, Cout, in_itemsize, budget_bytes=10 * 2 ** 20):
    """Pick TH (output rows per grid step) for the fused spatial kernel.

    The model counts (8,128)-padded bytes: the double-buffered input window, the dw/pw
    planes, ~32 live (TH, W*C) temporaries of the RFA section and the double-buffered
    output.  10 MiB is conservative for every generation (v7x included)."""
    def cost(th):
        li = _round_up((W + 6) * C, 128)
        lm = _round_up((W + 2) * C, 128)
        lo = _round_up(W * Cout, 128)
        lw = _round_up(W * C, 128)
        return (2 * _round_up(th + 10, 8) * li * in_itemsize
                + 4 * _round_up(th + 2, 8) * lm * 4
                + 32 * _round_up(th, 8) * lw * 4
                + 2 * _round_up(th, 8) * lo * 4)

    if cost(H) <= budget_bytes:
        return H, 1
    th = _round_up(max(8, H // 2), 8)
    while th > 8 and cost(th) > budget_bytes:
        th = _round_up(max(8, th // 2), 8)
    return th, -(-H // th)


# ----------------------------------------------------------------------------
# Kernel 1: cv1 — 1x1 conv (BN folded) + SiLU, one (rows, 2c) output buffer
# ----------------------------------------------------------------------------
def _cv1_kernel(x_ref, w_ref, b_ref, y_ref):
    acc = jnp.dot(x_ref[...], w_ref[...], preferred_element_type=jnp.float32)
    y_ref[...] = _silu(acc + b_ref[...]).astype(y_ref.dtype)


def cv1_conv(x2d, w, b, tile, out_dtype):
    RP, Cin = x2d.shape
    Cout = w.shape[1]
    return pl.pallas_call(
        _cv1_kernel,
        out_shape=jax.ShapeDtypeStruct((RP, Cout), out_dtype),
        grid_spec=pltpu.PrefetchScalarGridSpec(
            num_scalar_prefetch=0,
            grid=(RP // tile,),
            in_specs=[
                pl.BlockSpec((tile, Cin), lambda i: (i, 0)),
                pl.BlockSpec((Cin, Cout), lambda i: (0, 0)),
                pl.BlockSpec((1, Cout), lambda i: (0, 0)),
            ],
            out_specs=pl.BlockSpec((tile, Cout), lambda i: (i, 0)),
        ),
        compiler_params=pltpu.CompilerParams(
            dimension_semantics=("parallel",), vmem_limit_bytes=_VMEM_LIMIT),
    )(x2d, w, b.reshape(1, -1))


# ----------------------------------------------------------------------------
# Kernel 2: fused Bottleneck_RFADConv:
#   DW5x5 + BN + SiLU  ->  1x1 + BN + SiLU  ->  RFAConv (avgpool + grouped 1x1 softmax
#   + grouped 3x3 BN ReLU + stride-3 conv) — lane-packed (W*C) layout, t stays in VMEM.
# ----------------------------------------------------------------------------
def _bottleneck_kernel(y1_ref, dwk_ref, dwb_ref, pwblk_ref, pwb_ref,
                       gw_ref, gfw_ref, gfb_ref, rblk_ref, rfab_ref, o_ref,
                       *, TH, TP, H, W, C, Cout, nH):
    WC2 = (W + 2) * C
    x = y1_ref[...].astype(jnp.float32)                 # (TP+4, (W+6)*C) — f32 VPU math
    dwk = dwk_ref[...]                                   # (25, WC2), BN scale folded

    # depthwise 5x5 (+1 halo ring kept for the RFA 3x3 stage; TP rows for aligned matmul)
    acc = jnp.zeros((TP, WC2), jnp.float32)
    for i in range(5):
        xi = x[i:i + TP, :]
        for j in range(5):
            k = i * 5 + j
            acc = acc + xi[:, j * C:(j + W + 2) * C] * dwk[k:k + 1, :]
    dw = _silu(acc + dwb_ref[...])

    # pointwise 1x1 as a block-diagonal MXU matmul (stays lane-packed)
    t = _silu(jnp.dot(dw, pwblk_ref[...], preferred_element_type=jnp.float32)
              + pwb_ref[...])

    # zero the ring outside the real image (matches the reference's zero-padded t)
    gstart = 0 if nH == 1 else (pl.program_id(0) % nH) * TH
    ri = lax.broadcasted_iota(jnp.int32, (TP, WC2), 0) + gstart
    qi = lax.broadcasted_iota(jnp.int32, (TP, WC2), 1)
    keep = (ri >= 1) & (ri <= H) & (qi >= C) & (qi < (W + 1) * C)
    t = jnp.where(keep, t, 0.0)

    # 9 shifted taps shared by avgpool, grouped 3x3 conv and the softmax weighting
    shifts = [t[i:i + TH, j * C:(j + W) * C] for i in range(3) for j in range(3)]

    pooled = shifts[0]
    for k in range(1, 9):
        pooled = pooled + shifts[k]
    pooled = pooled * (1.0 / 9.0)                        # count_include_pad=True

    gw = gw_ref[...]                                     # (9, W*C)
    logits = [pooled * gw[n:n + 1, :] for n in range(9)]
    m = logits[0]
    for n in range(1, 9):
        m = jnp.maximum(m, logits[n])
    exps = [jnp.exp(logits[n] - m) for n in range(9)]
    den = exps[0]
    for n in range(1, 9):
        den = den + exps[n]
    inv = pl.reciprocal(den, approx=False)               # exact (correctness note)

    # grouped 3x3 feature conv (BN folded, ReLU) weighted by the softmax, then the
    # stride-3 conv of the rearranged tensor as 9 block-diagonal MXU matmuls.
    gfw = gfw_ref[...]                                   # (81, W*C)
    gfb = gfb_ref[...]                                   # (9,  W*C)
    out = jnp.zeros((TH, W * Cout), jnp.float32)
    for n in range(9):
        f = shifts[0] * gfw[n * 9:n * 9 + 1, :]
        for k in range(1, 9):
            f = f + shifts[k] * gfw[n * 9 + k:n * 9 + k + 1, :]
        f = jnp.maximum(f + gfb[n:n + 1, :], 0.0)
        wd = f * (exps[n] * inv)
        out = out + jnp.dot(wd, rblk_ref[n], preferred_element_type=jnp.float32)

    o_ref[...] = _silu(out + rfab_ref[...]).astype(o_ref.dtype)


def _pack_spatial_weights(P, W, C):
    """Tile / block-diagonalise the BN-folded weights for the lane-packed layout."""
    eye_w2 = jnp.eye(W + 2, dtype=jnp.float32)
    eye_w = jnp.eye(W, dtype=jnp.float32)
    dwkt = jnp.tile(P["dw1_wk"], (1, W + 2))                              # (25,(W+2)C)
    dwbt = jnp.tile(P["dw1_b"], W + 2).reshape(1, -1)
    pwblk = jnp.kron(eye_w2, P["pw1_wk"])                                 # ((W+2)C,(W+2)C)
    pwbt = jnp.tile(P["pw1_b"], W + 2).reshape(1, -1)
    gwt = jnp.tile(P["gw_k"], (1, W))                                     # (9, W*C)
    gfwt = jnp.tile(P["gf_wk"].reshape(81, C), (1, W))                    # (81, W*C)
    gfbt = jnp.tile(P["gf_bk"], (1, W))                                   # (9, W*C)
    rblk = jnp.stack([jnp.kron(eye_w, P["rfa_wk"][n * C:(n + 1) * C])
                      for n in range(9)])                                 # (9, W*C, W*C)
    rfabt = jnp.tile(P["rfa_b"], W).reshape(1, -1)                        # (1, W*Cout)
    return dwkt, dwbt, pwblk, pwbt, gwt, gfwt, gfbt, rblk, rfabt


def bottleneck_rfadconv(y1_img, P, interm_dtype):
    B, H, W, C = y1_img.shape
    Cout = C
    TH, nH = _choose_spatial_tile(H, W, C, Cout, jnp.dtype(interm_dtype).itemsize)
    TP = _round_up(TH + 2, 8)            # padded row count so the pw matmul M is aligned
    extra = TP - (TH + 2)
    Hp = nH * TH

    # zero-pad (+3 ring for the 5x5->3x3 halo; bottom also covers H->Hp and the TP padding)
    y1p = jnp.pad(y1_img, ((0, 0), (3, 3 + (Hp - H) + extra), (3, 3), (0, 0)))
    if nH > 1:
        # TODO(synk): express overlapping H windows with an element-offset index_map
        # instead of this gather; never triggered at the shapes exercised here.
        y1p = jnp.stack([y1p[:, i * TH:i * TH + TP + 4] for i in range(nH)], axis=1)
        y1p = y1p.reshape(B * nH, TP + 4, W + 6, C)
    NT = B * nH
    y1p = y1p.reshape(NT, TP + 4, (W + 6) * C)           # lane-packed input

    dwkt, dwbt, pwblk, pwbt, gwt, gfwt, gfbt, rblk, rfabt = _pack_spatial_weights(P, W, C)

    kern = functools.partial(_bottleneck_kernel, TH=TH, TP=TP, H=H, W=W, C=C,
                             Cout=Cout, nH=nH)
    out = pl.pallas_call(
        kern,
        out_shape=jax.ShapeDtypeStruct((NT, TH, W * Cout), interm_dtype),
        grid_spec=pltpu.PrefetchScalarGridSpec(
            num_scalar_prefetch=0,
            grid=(NT,),
            in_specs=[
                pl.BlockSpec((None, TP + 4, (W + 6) * C), lambda g: (g, 0, 0)),
                pl.BlockSpec((25, (W + 2) * C), lambda g: (0, 0)),
                pl.BlockSpec((1, (W + 2) * C), lambda g: (0, 0)),
                pl.BlockSpec(((W + 2) * C, (W + 2) * C), lambda g: (0, 0)),
                pl.BlockSpec((1, (W + 2) * C), lambda g: (0, 0)),
                pl.BlockSpec((9, W * C), lambda g: (0, 0)),
                pl.BlockSpec((81, W * C), lambda g: (0, 0)),
                pl.BlockSpec((9, W * C), lambda g: (0, 0)),
                pl.BlockSpec((9, W * C, W * Cout), lambda g: (0, 0, 0)),
                pl.BlockSpec((1, W * Cout), lambda g: (0, 0)),
            ],
            out_specs=pl.BlockSpec((None, TH, W * Cout), lambda g: (g, 0, 0)),
        ),
        compiler_params=pltpu.CompilerParams(
            dimension_semantics=("parallel",), vmem_limit_bytes=_VMEM_LIMIT),
    )(y1p, dwkt, dwbt, pwblk, pwbt, gwt, gfwt, gfbt, rblk, rfabt)
    return out.reshape(B, Hp, W, Cout)[:, :H]


# ----------------------------------------------------------------------------
# Kernel 3: cv2 — 1x1 conv on concat([y0|y1, y2]) WITHOUT materializing the concat
# ----------------------------------------------------------------------------
def _cv2_kernel(y01_ref, y2_ref, w01_ref, w2_ref, b_ref, o_ref):
    acc = jnp.dot(y01_ref[...].astype(jnp.float32), w01_ref[...],
                  preferred_element_type=jnp.float32)
    acc = acc + jnp.dot(y2_ref[...].astype(jnp.float32), w2_ref[...],
                        preferred_element_type=jnp.float32)
    o_ref[...] = _silu(acc + b_ref[...]).astype(o_ref.dtype)


def cv2_conv(y01, y2, w01, w2, b, tile):
    RP, c01 = y01.shape
    c_ = y2.shape[1]
    c2 = w01.shape[1]
    return pl.pallas_call(
        _cv2_kernel,
        out_shape=jax.ShapeDtypeStruct((RP, c2), jnp.float32),
        grid_spec=pltpu.PrefetchScalarGridSpec(
            num_scalar_prefetch=0,
            grid=(RP // tile,),
            in_specs=[
                pl.BlockSpec((tile, c01), lambda i: (i, 0)),
                pl.BlockSpec((tile, c_), lambda i: (i, 0)),
                pl.BlockSpec((c01, c2), lambda i: (0, 0)),
                pl.BlockSpec((c_, c2), lambda i: (0, 0)),
                pl.BlockSpec((1, c2), lambda i: (0, 0)),
            ],
            out_specs=pl.BlockSpec((tile, c2), lambda i: (i, 0)),
        ),
        compiler_params=pltpu.CompilerParams(
            dimension_semantics=("parallel",), vmem_limit_bytes=_VMEM_LIMIT),
    )(y01, y2, w01, w2, b.reshape(1, -1))


# ----------------------------------------------------------------------------
# Parameter construction (deterministic, synthetic).  n=1 bottleneck, shortcut=False.
# ----------------------------------------------------------------------------
def _bn_fold(key, ch, eps=1e-5):
    k1, k2, k3, k4 = jax.random.split(key, 4)
    gamma = 1.0 + 0.1 * jax.random.normal(k1, (ch,), jnp.float32)
    beta = 0.1 * jax.random.normal(k2, (ch,), jnp.float32)
    mean = 0.1 * jax.random.normal(k3, (ch,), jnp.float32)
    var = jax.random.uniform(k4, (ch,), jnp.float32, 0.5, 1.5)
    scale = gamma / jnp.sqrt(var + eps)
    bias = beta - mean * scale
    return scale, bias


def init_params(key, c1, c2, n=1, e=0.5):
    assert n == 1, "this synthetic implementation instantiates n=1 bottleneck"
    c = int(c2 * e)
    keys = iter(jax.random.split(key, 32))

    def w(shape, fan_in):
        return jax.random.normal(next(keys), shape, jnp.float32) / jnp.sqrt(float(fan_in))

    P = {"c": c, "c2": c2}
    # PyTorch-format (OIHW) weights for the reference path
    P["cv1_w_t"] = w((2 * c, c1, 1, 1), c1)
    P["cv1_s"], P["cv1_b"] = _bn_fold(next(keys), 2 * c)
    P["dw1_w_t"] = w((c, 1, 5, 5), 25)
    P["dw1_s"], P["dw1_b"] = _bn_fold(next(keys), c)
    P["pw1_w_t"] = w((c, c, 1, 1), c)
    P["pw1_s"], P["pw1_b"] = _bn_fold(next(keys), c)
    P["gw_t"] = w((c * 9, 1, 1, 1), 1)
    P["gf_w_t"] = w((c * 9, 1, 3, 3), 9)
    P["gf_s"], P["gf_b"] = _bn_fold(next(keys), c * 9)
    P["rfa_w_t"] = w((c, c, 3, 3), c * 9)
    P["rfa_s"], P["rfa_b"] = _bn_fold(next(keys), c)
    P["cv2_w_t"] = w((c2, (2 + n) * c, 1, 1), (2 + n) * c)
    P["cv2_s"], P["cv2_b"] = _bn_fold(next(keys), c2)

    # kernel-format weights with the BN scale folded in
    P["cv1_wk"] = P["cv1_w_t"][:, :, 0, 0].T * P["cv1_s"][None, :]             # (c1, 2c)
    P["dw1_wk"] = P["dw1_w_t"][:, 0].reshape(c, 25).T * P["dw1_s"][None, :]    # (25, c)
    P["pw1_wk"] = P["pw1_w_t"][:, :, 0, 0].T * P["pw1_s"][None, :]             # (c, c)
    P["gw_k"] = P["gw_t"][:, 0, 0, 0].reshape(c, 9).T                          # (9, c)
    gf = P["gf_w_t"][:, 0].reshape(c, 9, 9) * P["gf_s"].reshape(c, 9)[:, :, None]
    P["gf_wk"] = jnp.transpose(gf, (1, 2, 0))                                  # (9, 9, c)
    P["gf_bk"] = P["gf_b"].reshape(c, 9).T                                     # (9, c)
    P["rfa_wk"] = (P["rfa_w_t"].transpose(2, 3, 1, 0).reshape(9 * c, c)
                   * P["rfa_s"][None, :])                                      # (9c, c)
    cv2k = P["cv2_w_t"][:, :, 0, 0].T * P["cv2_s"][None, :]                    # (3c, c2)
    P["cv2_wk01"], P["cv2_wk2"] = cv2k[:2 * c], cv2k[2 * c:]
    return P


# ----------------------------------------------------------------------------
# C2f_RFADConv forward built from the fused Pallas kernels (n=1, shortcut=False)
# ----------------------------------------------------------------------------
def c2f_rfadconv_forward(x_nchw, P, interm_dtype=jnp.float32):
    B, C1, H, W = x_nchw.shape
    c, c2 = P["c"], P["c2"]
    R = B * H * W
    tile, RP = _row_tile(R)

    x = jnp.transpose(x_nchw, (0, 2, 3, 1)).reshape(R, C1)
    if RP != R:
        x = jnp.pad(x, ((0, RP - R), (0, 0)))

    # cv1: 1x1 conv + BN + SiLU -> single (rows, 2c) buffer (y0 | y1)
    y01 = cv1_conv(x, P["cv1_wk"], P["cv1_b"], tile, interm_dtype)

    # Bottleneck_RFADConv on y1 (shortcut=False): one fused spatial kernel
    y1_img = y01[:R, c:].reshape(B, H, W, c)
    y2_img = bottleneck_rfadconv(y1_img, P, interm_dtype)
    y2 = y2_img.reshape(R, c)
    if RP != R:
        y2 = jnp.pad(y2, ((0, RP - R), (0, 0)))

    # cv2 over concat([y0, y1, y2]) without materializing the concat
    # (padding rows carry SiLU(bias) garbage and are sliced off below — benign)
    out = cv2_conv(y01, y2, P["cv2_wk01"], P["cv2_wk2"], P["cv2_b"], tile)[:R]
    return jnp.transpose(out.reshape(B, H, W, c2), (0, 3, 1, 2))


# ----------------------------------------------------------------------------
# Pure-JAX NCHW reference (mirrors the PyTorch graph) for correctness checking
# ----------------------------------------------------------------------------
def _conv_ref(x, w, stride=1, padding=0, groups=1):
    return jax.lax.conv_general_dilated(
        x, w, (stride, stride), [(padding, padding), (padding, padding)],
        dimension_numbers=("NCHW", "OIHW", "NCHW"),
        feature_group_count=groups, precision=jax.lax.Precision.HIGHEST)


def _avgpool3_ref(x):
    s = jax.lax.reduce_window(x, 0.0, jax.lax.add, (1, 1, 3, 3), (1, 1, 1, 1),
                              [(0, 0), (0, 0), (1, 1), (1, 1)])
    return s / 9.0


def reference_forward(x, P):
    c, c2 = P["c"], P["c2"]
    B, _, H, W = x.shape
    silu = lambda v: v * jax.nn.sigmoid(v)
    bnf = lambda v, s, b: v * s[None, :, None, None] + b[None, :, None, None]

    y = silu(bnf(_conv_ref(x, P["cv1_w_t"]), P["cv1_s"], P["cv1_b"]))
    y0, y1 = y[:, :c], y[:, c:]
    dw = silu(bnf(_conv_ref(y1, P["dw1_w_t"], padding=2, groups=c), P["dw1_s"], P["dw1_b"]))
    t = silu(bnf(_conv_ref(dw, P["pw1_w_t"]), P["pw1_s"], P["pw1_b"]))
    pooled = _avgpool3_ref(t)
    logits = _conv_ref(pooled, P["gw_t"], groups=c).reshape(B, c, 9, H, W)
    soft = jax.nn.softmax(logits, axis=2)
    feat = jnp.maximum(
        bnf(_conv_ref(t, P["gf_w_t"], padding=1, groups=c), P["gf_s"], P["gf_b"]), 0.0
    ).reshape(B, c, 9, H, W)
    wd = feat * soft
    conv_data = wd.reshape(B, c, 3, 3, H, W).transpose(0, 1, 4, 2, 5, 3).reshape(B, c, 3 * H, 3 * W)
    y2 = silu(bnf(_conv_ref(conv_data, P["rfa_w_t"], stride=3), P["rfa_s"], P["rfa_b"]))
    cat = jnp.concatenate([y0, y1, y2], axis=1)
    return silu(bnf(_conv_ref(cat, P["cv2_w_t"]), P["cv2_s"], P["cv2_b"]))


# ----------------------------------------------------------------------------
if __name__ == "__main__":
    key = jax.random.PRNGKey(0)
    kx, kp = jax.random.split(key)

    B, c1, c2, H, W = 2, 8, 16, 16, 16          # c = 8 -> W*C = 128 (lane-dense tiles)
    x = jax.random.normal(kx, (B, c1, H, W), jnp.float32)
    P = init_params(kp, c1, c2, n=1, e=0.5)

    ref = jax.block_until_ready(reference_forward(x, P))
    scl = float(jnp.max(jnp.abs(ref))) + 1e-6

    # f32 intermediates: tight check
    out = jax.block_until_ready(c2f_rfadconv_forward(x, P, interm_dtype=jnp.float32))
    assert out.shape == (B, c2, H, W), out.shape
    err = float(jnp.max(jnp.abs(out - ref)))
    assert err <= 3e-2 * scl + 1e-4, f"f32 kernel/reference mismatch: {err} (scale {scl})"

    # bf16 HBM intermediates (recommended on v6e/v7x), f32 math in-kernel: loose sanity bound
    out16 = jax.block_until_ready(c2f_rfadconv_forward(x, P, interm_dtype=jnp.bfloat16))
    assert out16.shape == (B, c2, H, W), out16.shape
    err16 = float(jnp.max(jnp.abs(out16 - ref)))
    assert err16 <= 1e-1 * scl + 1e-2, f"bf16 kernel/reference mismatch: {err16} (scale {scl})"

    print("KERNEL_OK")
</pallas_src>

<mosaic_0001>
module attributes {stable_mosaic.version = 11 : i64} {
  func.func @_cv1_kernel(%arg0: i32, %arg1: memref<512x8xf32, #tpu.memory_space<vmem>>, %arg2: memref<8x16xf32, #tpu.memory_space<vmem>>, %arg3: memref<1x16xf32, #tpu.memory_space<vmem>>, %arg4: memref<512x16xf32, #tpu.memory_space<vmem>>) attributes {dimension_semantics = [#tpu.dimension_semantics<parallel>], iteration_bounds = array<i64: 1>, scalar_prefetch = 0 : i64, scratch_operands = 0 : i64, tpu.core_type = #tpu.core_type<tc>, window_params = [{transform_indices = @transform_0, window_bounds = array<i64: 512, 8>}, {pipeline_mode = #tpu.pipeline_mode<synchronous>, transform_indices = @transform_1, window_bounds = array<i64: 8, 16>}, {pipeline_mode = #tpu.pipeline_mode<synchronous>, transform_indices = @transform_2, window_bounds = array<i64: 1, 16>}, {transform_indices = @transform_3, window_bounds = array<i64: 512, 16>}]} {
    %c0 = arith.constant 0 : index
    %c0_0 = arith.constant 0 : index
    %0 = vector.load %arg1[%c0, %c0_0] : memref<512x8xf32, #tpu.memory_space<vmem>>, vector<512x8xf32>
    %c0_1 = arith.constant 0 : index
    %c0_2 = arith.constant 0 : index
    %1 = vector.load %arg2[%c0_1, %c0_2] : memref<8x16xf32, #tpu.memory_space<vmem>>, vector<8x16xf32>
    %cst = arith.constant dense<0.000000e+00> : vector<512x16xf32>
    %2 = tpu.matmul %0, %1, %cst {dimension_numbers = #tpu.dot_dimension_numbers<[1], [0], [0], [1], [0, 0, 1, 1], [], []>} : vector<512x8xf32>, vector<8x16xf32>, vector<512x16xf32> -> vector<512x16xf32>
    %c0_3 = arith.constant 0 : index
    %c0_4 = arith.constant 0 : index
    %3 = vector.load %arg3[%c0_3, %c0_4] : memref<1x16xf32, #tpu.memory_space<vmem>>, vector<1x16xf32>
    %4 = vector.broadcast %3 : vector<1x16xf32> to vector<512x16xf32>
    %5 = arith.addf %2, %4 : vector<512x16xf32>
    %6 = arith.negf %5 : vector<512x16xf32>
    %7 = math.exp %6 : vector<512x16xf32>
    %cst_5 = arith.constant 1.000000e+00 : f32
    %8 = vector.broadcast %cst_5 : f32 to vector<512x16xf32>
    %9 = arith.addf %8, %7 : vector<512x16xf32>
    %10 = arith.divf %8, %9 : vector<512x16xf32>
    %11 = arith.mulf %5, %10 : vector<512x16xf32>
    %c0_6 = arith.constant 0 : index
    %c0_7 = arith.constant 0 : index
    %12 = vector.load %arg4[%c0_6, %c0_7] : memref<512x16xf32, #tpu.memory_space<vmem>>, vector<512x16xf32>
    tpu.vector_store %arg4[%c0_6, %c0_7], %11 {strides = array<i32>} : memref<512x16xf32, #tpu.memory_space<vmem>>, vector<512x16xf32>,
    return
  }
  func.func @transform_0(%arg0: i32) -> (i32, i32) {
    %c0_i32 = arith.constant 0 : i32
    %c0_i32_0 = arith.constant 0 : i32
    return %arg0, %c0_i32 : i32, i32
  }
  func.func @transform_1(%arg0: i32) -> (i32, i32) {
    %c0_i32 = arith.constant 0 : i32
    %c0_i32_0 = arith.constant 0 : i32
    %c0_i32_1 = arith.constant 0 : i32
    return %c0_i32, %c0_i32_0 : i32, i32
  }
  func.func @transform_2(%arg0: i32) -> (i32, i32) {
    %c0_i32 = arith.constant 0 : i32
    %c0_i32_0 = arith.constant 0 : i32
    %c0_i32_1 = arith.constant 0 : i32
    return %c0_i32, %c0_i32_0 : i32, i32
  }
  func.func @transform_3(%arg0: i32) -> (i32, i32) {
    %c0_i32 = arith.constant 0 : i32
    %c0_i32_0 = arith.constant 0 : i32
    return %arg0, %c0_i32 : i32, i32
  }
}

</mosaic_0001>

<bundles_post_ra>
// kernel: tpu_custom_call.1
= control target key start
LH: loop header
LB: loop body
LE: loop exit
PB: predicated region body
PF: predicated region fallthrough
CT: control target
= control target key end

     0   :  { %vm86_vm0 = vcmask 64512   ;;  %vm1112_vm1 = vcmask 130048   ;;  %s2654_s1 = inlined_call_operand.vmem [shape: f32[8,16], index: 1, kind: input, shape index: {}]   ;;  %s2655_s0 = inlined_call_operand.vmem [shape: f32[512,8], index: 0, kind: input, shape index: {}]   ;;  %s2656_s2 = inlined_call_operand.vmem [shape: f32[1,16], index: 2, kind: input, shape index: {}]   ;;  %s2657_s3 = inlined_call_operand.vmem [shape: f32[512,16], index: 3, kind: output, shape index: {}]  }
   0x1   :  { %v78_v0 = vld [vmem:[%s2654_s1] sm:$0xff]  ;;  %v15_v3 = vld [vmem:[%s2655_s0 + $0x8] sm:$0xff]  ;;  %v16_v5 = vld [vmem:[%s2655_s0 + $0x10] sm:$0xff] }
   0x2   :  { %v14_v1 = vld [vmem:[%s2655_s0] sm:$0xff]  ;;  %1375 = vmatprep.subr.mxu0 %v78_v0  ;;  %1473 = vmatprep.subr.mxu1 %v78_v0  ;;  %v47_v4 = vld [vmem:[%s2655_s0 + $0x108] sm:$0xff]  ;;  %v48_v6 = vld [vmem:[%s2655_s0 + $0x110] sm:$0xff] }
   0x3   :  { %v46_v2 = vld [vmem:[%s2655_s0 + $0x100] sm:$0xff]  ;;  %1376 = vmatpush3.msra.mxu0 %v78_v0  ;;  %1474 = vmatpush3.msra.mxu1 %v78_v0  ;;  %v17_v7 = vld [vmem:[%s2655_s0 + $0x18] sm:$0xff]  ;;  %v19_v11 = vld [vmem:[%s2655_s0 + $0x28] sm:$0xff] }
   0x4   :  { %1377 = vmatprep.mubr.msk.f32.mxu0 %vm86_vm0, %v14_v1  ;;  %1425 = vmatprep.mubr.msk.f32.mxu1 %vm86_vm0, %v46_v2  ;;  %v49_v8 = vld [vmem:[%s2655_s0 + $0x118] sm:$0xff]  ;;  %v18_v9 = vld [vmem:[%s2655_s0 + $0x20] sm:$0xff]  ;;  %v51_v12 = vld [vmem:[%s2655_s0 + $0x128] sm:$0xff] }
   0x5   :  { %1378 = vmatmul.mubr.msk.f32.vlgmr.msra.gmra.mrb[0].mxu0 %vm86_vm0, %v15_v3  ;;  %1426 = vmatmul.mubr.msk.f32.vlgmr.msra.gmra.mrb[0].mxu1 %vm86_vm0, %v47_v4  ;;  %v50_v10 = vld [vmem:[%s2655_s0 + $0x120] sm:$0xff]  ;;  %v20_v13 = vld [vmem:[%s2655_s0 + $0x30] sm:$0xff]  ;;  %v21_v15 = vld [vmem:[%s2655_s0 + $0x38] sm:$0xff] }
   0x6   :  { %1380 = vmatprep.mubr.msk.f32.mxu0 %vm86_vm0, %v16_v5  ;;  %1428 = vmatprep.mubr.msk.f32.mxu1 %vm86_vm0, %v48_v6  ;;  %v52_v14 = vld [vmem:[%s2655_s0 + $0x130] sm:$0xff]  ;;  %v53_v16 = vld [vmem:[%s2655_s0 + $0x138] sm:$0xff]  ;;  %v22_v17 = vld [vmem:[%s2655_s0 + $0x40] sm:$0xff] }
   0x7   :  { %v54_v18 = vld [vmem:[%s2655_s0 + $0x140] sm:$0xff]  ;;  %v23_v19 = vld [vmem:[%s2655_s0 + $0x48] sm:$0xff]  ;;  %v24_v21 = vld [vmem:[%s2655_s0 + $0x50] sm:$0xff] }
   0x8   :  { %v55_v20 = vld [vmem:[%s2655_s0 + $0x148] sm:$0xff]  ;;  %v56_v22 = vld [vmem:[%s2655_s0 + $0x150] sm:$0xff]  ;;  %v25_v23 = vld [vmem:[%s2655_s0 + $0x58] sm:$0xff] }
   0x9   :  { %1381 = vmatmul.mubr.msk.f32.gmra.mrb[2].mxu0 %vm86_vm0, %v17_v7  ;;  %1429 = vmatmul.mubr.msk.f32.gmra.mrb[2].mxu1 %vm86_vm0, %v49_v8  ;;  %v57_v24 = vld [vmem:[%s2655_s0 + $0x158] sm:$0xff]  ;;  %v26_v25 = vld [vmem:[%s2655_s0 + $0x60] sm:$0xff]  ;;  %v27_v27 = vld [vmem:[%s2655_s0 + $0x68] sm:$0xff] }
   0xa   :  { %1383 = vmatprep.mubr.msk.f32.mxu0 %vm86_vm0, %v18_v9  ;;  %1431 = vmatprep.mubr.msk.f32.mxu1 %vm86_vm0, %v50_v10  ;;  %v58_v26 = vld [vmem:[%s2655_s0 + $0x160] sm:$0xff]  ;;  %v59_v28 = vld [vmem:[%s2655_s0 + $0x168] sm:$0xff]  ;;  %v28_v29 = vld [vmem:[%s2655_s0 + $0x70] sm:$0xff] }
   0xb   :  { %v60_v30 = vld [vmem:[%s2655_s0 + $0x170] sm:$0xff]  ;;  %v29_v31 = vld [vmem:[%s2655_s0 + $0x78] sm:$0xff]  ;;  %v30_v33 = vld [vmem:[%s2655_s0 + $0x80] sm:$0xff] }
   0xc   :  { %v61_v32 = vld [vmem:[%s2655_s0 + $0x178] sm:$0xff]  ;;  %v62_v34 = vld [vmem:[%s2655_s0 + $0x180] sm:$0xff]  ;;  %v31_v35 = vld [vmem:[%s2655_s0 + $0x88] sm:$0xff] }
   0xd   :  { %1384 = vmatmul.mubr.msk.f32.gmra.mrb[4].mxu0 %vm86_vm0, %v19_v11  ;;  %1432 = vmatmul.mubr.msk.f32.gmra.mrb[4].mxu1 %vm86_vm0, %v51_v12  ;;  %v63_v36 = vld [vmem:[%s2655_s0 + $0x188] sm:$0xff]  ;;  %v32_v37 = vld [vmem:[%s2655_s0 + $0x90] sm:$0xff]  ;;  %v33_v39 = vld [vmem:[%s2655_s0 + $0x98] sm:$0xff] }
   0xe   :  { %1386 = vmatprep.mubr.msk.f32.mxu0 %vm86_vm0, %v20_v13  ;;  %1434 = vmatprep.mubr.msk.f32.mxu1 %vm86_vm0, %v52_v14  ;;  %v64_v38 = vld [vmem:[%s2655_s0 + $0x190] sm:$0xff]  ;;  %v65_v40 = vld [vmem:[%s2655_s0 + $0x198] sm:$0xff]  ;;  %v34_v41 = vld [vmem:[%s2655_s0 + $0xa0] sm:$0xff] }
   0xf   :  { %v66_v42 = vld [vmem:[%s2655_s0 + $0x1a0] sm:$0xff]  ;;  %v35_v43 = vld [vmem:[%s2655_s0 + $0xa8] sm:$0xff]  ;;  %v36_v45 = vld [vmem:[%s2655_s0 + $0xb0] sm:$0xff] }
  0x10   :  { %v67_v44 = vld [vmem:[%s2655_s0 + $0x1a8] sm:$0xff]  ;;  %v68_v46 = vld [vmem:[%s2655_s0 + $0x1b0] sm:$0xff]  ;;  %v37_v47 = vld [vmem:[%s2655_s0 + $0xb8] sm:$0xff] }
  0x11   :  { %1387 = vmatmul.mubr.msk.f32.gmra.mrb[6].mxu0 %vm86_vm0, %v21_v15  ;;  %1435 = vmatmul.mubr.msk.f32.gmra.mrb[6].mxu1 %vm86_vm0, %v53_v16  ;;  %v69_v48 = vld [vmem:[%s2655_s0 + $0x1b8] sm:$0xff]  ;;  %v38_v49 = vld [vmem:[%s2655_s0 + $0xc0] sm:$0xff]  ;;  %v39_v51 = vld [vmem:[%s2655_s0 + $0xc8] sm:$0xff] }
  0x12   :  { %1389 = vmatprep.mubr.msk.f32.mxu0 %vm86_vm0, %v22_v17  ;;  %1437 = vmatprep.mubr.msk.f32.mxu1 %vm86_vm0, %v54_v18  ;;  %v70_v50 = vld [vmem:[%s2655_s0 + $0x1c0] sm:$0xff]  ;;  %v71_v52 = vld [vmem:[%s2655_s0 + $0x1c8] sm:$0xff]  ;;  %v40_v53 = vld [vmem:[%s2655_s0 + $0xd0] sm:$0xff] }
  0x13   :  { %v72_v54 = vld [vmem:[%s2655_s0 + $0x1d0] sm:$0xff]  ;;  %v41_v55 = vld [vmem:[%s2655_s0 + $0xd8] sm:$0xff]  ;;  %v42_v57 = vld [vmem:[%s2655_s0 + $0xe0] sm:$0xff] }
  0x14   :  { %v73_v56 = vld [vmem:[%s2655_s0 + $0x1d8] sm:$0xff]  ;;  %v74_v58 = vld [vmem:[%s2655_s0 + $0x1e0] sm:$0xff]  ;;  %v43_v59 = vld [vmem:[%s2655_s0 + $0xe8] sm:$0xff] }
  0x15   :  { %1390 = vmatmul.mubr.msk.f32.gmra.mrb[8].mxu0 %vm86_vm0, %v23_v19  ;;  %1438 = vmatmul.mubr.msk.f32.gmra.mrb[8].mxu1 %vm86_vm0, %v55_v20  ;;  %v75_v60 = vld [vmem:[%s2655_s0 + $0x1e8] sm:$0xff]  ;;  %v44_v61 = vld [vmem:[%s2655_s0 + $0xf0] sm:$0xff]  ;;  %v45_v63 = vld [vmem:[%s2655_s0 + $0xf8] sm:$0xff] }
  0x16   :  { %1392 = vmatprep.mubr.msk.f32.mxu0 %vm86_vm0, %v24_v21  ;;  %1440 = vmatprep.mubr.msk.f32.mxu1 %vm86_vm0, %v56_v22  ;;  %v76_v62 = vld [vmem:[%s2655_s0 + $0x1f0] sm:$0xff]  ;;  %v77_v0 = vld [vmem:[%s2655_s0 + $0x1f8] sm:$0xff]  ;;  %v2013_v1 = vld [vmem:[%s2656_s2] ss:$0 sm:$0xff] }
  0x19   :  { %1393 = vmatmul.mubr.msk.f32.gmra.mrb[10].mxu0 %vm86_vm0, %v25_v23  ;;  %1441 = vmatmul.mubr.msk.f32.gmra.mrb[10].mxu1 %vm86_vm0, %v57_v24 }
  0x1a   :  { %1395 = vmatprep.mubr.msk.f32.mxu0 %vm86_vm0, %v26_v25  ;;  %1443 = vmatprep.mubr.msk.f32.mxu1 %vm86_vm0, %v58_v26 }
  0x1d   :  { %1396 = vmatmul.mubr.msk.f32.gmra.mrb[12].mxu0 %vm86_vm0, %v27_v27  ;;  %1444 = vmatmul.mubr.msk.f32.gmra.mrb[12].mxu1 %vm86_vm0, %v59_v28 }
  0x1e   :  { %1398 = vmatprep.mubr.msk.f32.mxu0 %vm86_vm0, %v28_v29  ;;  %1446 = vmatprep.mubr.msk.f32.mxu1 %vm86_vm0, %v60_v30 }
  0x21   :  { %1399 = vmatmul.mubr.msk.f32.gmra.mrb[14].mxu0 %vm86_vm0, %v29_v31  ;;  %1447 = vmatmul.mubr.msk.f32.gmra.mrb[14].mxu1 %vm86_vm0, %v61_v32 }
  0x22   :  { %1401 = vmatprep.mubr.msk.f32.mxu0 %vm86_vm0, %v30_v33  ;;  %1449 = vmatprep.mubr.msk.f32.mxu1 %vm86_vm0, %v62_v34 }
  0x25   :  { %1402 = vmatmul.mubr.msk.f32.gmra.mrb[16].mxu0 %vm86_vm0, %v31_v35  ;;  %1450 = vmatmul.mubr.msk.f32.gmra.mrb[16].mxu1 %vm86_vm0, %v63_v36 }
  0x26   :  { %1404 = vmatprep.mubr.msk.f32.mxu0 %vm86_vm0, %v32_v37  ;;  %1452 = vmatprep.mubr.msk.f32.mxu1 %vm86_vm0, %v64_v38 }
  0x29   :  { %1405 = vmatmul.mubr.msk.f32.gmra.mrb[18].mxu0 %vm86_vm0, %v33_v39  ;;  %1453 = vmatmul.mubr.msk.f32.gmra.mrb[18].mxu1 %vm86_vm0, %v65_v40 }
  0x2a   :  { %1407 = vmatprep.mubr.msk.f32.mxu0 %vm86_vm0, %v34_v41  ;;  %1455 = vmatprep.mubr.msk.f32.mxu1 %vm86_vm0, %v66_v42 }
  0x2d   :  { %1408 = vmatmul.mubr.msk.f32.gmra.mrb[20].mxu0 %vm86_vm0, %v35_v43  ;;  %1456 = vmatmul.mubr.msk.f32.gmra.mrb[20].mxu1 %vm86_vm0, %v67_v44 }
  0x2e   :  { %1410 = vmatprep.mubr.msk.f32.mxu0 %vm86_vm0, %v36_v45  ;;  %1458 = vmatprep.mubr.msk.f32.mxu1 %vm86_vm0, %v68_v46 }
  0x31   :  { %1411 = vmatmul.mubr.msk.f32.gmra.mrb[22].mxu0 %vm86_vm0, %v37_v47  ;;  %1459 = vmatmul.mubr.msk.f32.gmra.mrb[22].mxu1 %vm86_vm0, %v69_v48 }
  0x32   :  { %1413 = vmatprep.mubr.msk.f32.mxu0 %vm86_vm0, %v38_v49  ;;  %1461 = vmatprep.mubr.msk.f32.mxu1 %vm86_vm0, %v70_v50 }
  0x35   :  { %1414 = vmatmul.mubr.msk.f32.gmra.mrb[24].mxu0 %vm86_vm0, %v39_v51  ;;  %1462 = vmatmul.mubr.msk.f32.gmra.mrb[24].mxu1 %vm86_vm0, %v71_v52 }
  0x36   :  { %1416 = vmatprep.mubr.msk.f32.mxu0 %vm86_vm0, %v40_v53  ;;  %1464 = vmatprep.mubr.msk.f32.mxu1 %vm86_vm0, %v72_v54 }
  0x39   :  { %1417 = vmatmul.mubr.msk.f32.gmra.mrb[26].mxu0 %vm86_vm0, %v41_v55  ;;  %1465 = vmatmul.mubr.msk.f32.gmra.mrb[26].mxu1 %vm86_vm0, %v73_v56 }
  0x3a   :  { %1419 = vmatprep.mubr.msk.f32.mxu0 %vm86_vm0, %v42_v57  ;;  %1467 = vmatprep.mubr.msk.f32.mxu1 %vm86_vm0, %v74_v58 }
  0x3d   :  { %1420 = vmatmul.mubr.msk.f32.gmra.mrb[28].mxu0 %vm86_vm0, %v43_v59  ;;  %1468 = vmatmul.mubr.msk.f32.gmra.mrb[28].mxu1 %vm86_vm0, %v75_v60 }
  0x3e   :  { %1422 = vmatprep.mubr.msk.f32.mxu0 %vm86_vm0, %v44_v61  ;;  %1470 = vmatprep.mubr.msk.f32.mxu1 %vm86_vm0, %v76_v62 }
  0x41   :  { %1423 = vmatmul.mubr.msk.f32.gmra.mrb[30].mxu0 %vm86_vm0, %v45_v63  ;;  %1471 = vmatmul.mubr.msk.f32.gmra.mrb[30].mxu1 %vm86_vm0, %v77_v0 }
  0xd8   :  { %v1379_v2 = vpop.f32.mrb[0].mxu0  ;;  %v1427_v3 = vpop.f32.mrb[0].mxu1 }
  0xd9   :  { %v2016_v4 = vadd.f32 %v1379_v2, %v2013_v1  ;;  %v2019_v5 = vadd.f32 %v1427_v3, %v2013_v1  ;;  %v345_v6 = vpop.f32.mrb[1].mxu0  ;;  %v505_v7 = vpop.f32.mrb[1].mxu1 }
  0xda   :  { %v2022_v8 = vadd.f32 %v2013_v1, %v345_v6  ;;  %v2025_v9 = vadd.f32 %v2013_v1, %v505_v7 }
  0xdb   :  { %v1247_v10 = vmul.f32 -1.442695, %v2016_v4  ;;  %v1279_v11 = vmul.f32 -1.442695, %v2019_v5 }
  0xdc   :  { %v1246_v12 = vmul.f32 -1.442695, %v2022_v8  ;;  %v1278_v13 = vmul.f32 -1.442695, %v2025_v9  ;;  %v1382_v14 = vpop.f32.mrb[2].mxu0  ;;  %v1430_v15 = vpop.f32.mrb[2].mxu1 }
  0xdd   :  { %1475 = vpow2.f32 %v1247_v10  ;;  %v2032_v16 = vadd.f32 %v1382_v14, %v2013_v1  ;;  %v2035_v17 = vadd.f32 %v1430_v15, %v2013_v1  ;;  %v355_v18 = vpop.f32.mrb[3].mxu0  ;;  %v515_v19 = vpop.f32.mrb[3].mxu1 }
  0xde   :  { %1477 = vpow2.f32 %v1279_v11  ;;  %v2038_v20 = vadd.f32 %v2013_v1, %v355_v18  ;;  %v2041_v21 = vadd.f32 %v2013_v1, %v515_v19 }
  0xdf   :  { %1479 = vpow2.f32 %v1246_v12  ;;  %v1249_v22 = vmul.f32 -1.442695, %v2032_v16  ;;  %v1281_v23 = vmul.f32 -1.442695, %v2035_v17 }
  0xe0   :  { %1481 = vpow2.f32 %v1278_v13  ;;  %v1248_v24 = vmul.f32 -1.442695, %v2038_v20  ;;  %v1280_v25 = vmul.f32 -1.442695, %v2041_v21  ;;  %v1385_v26 = vpop.f32.mrb[4].mxu0  ;;  %v1433_v27 = vpop.f32.mrb[4].mxu1 }
  0xe1   :  { %1483 = vpow2.f32 %v1249_v22  ;;  %v2048_v28 = vadd.f32 %v1385_v26, %v2013_v1  ;;  %v2051_v29 = vadd.f32 %v1433_v27, %v2013_v1  ;;  %v365_v30 = vpop.f32.mrb[5].mxu0  ;;  %v525_v31 = vpop.f32.mrb[5].mxu1 }
  0xe2   :  { %1485 = vpow2.f32 %v1281_v23  ;;  %v2054_v32 = vadd.f32 %v2013_v1, %v365_v30  ;;  %v2057_v33 = vadd.f32 %v2013_v1, %v525_v31 }
  0xe3   :  { %1487 = vpow2.f32 %v1248_v24  ;;  %v1251_v34 = vmul.f32 -1.442695, %v2048_v28  ;;  %v1283_v35 = vmul.f32 -1.442695, %v2051_v29 }
  0xe4   :  { %1489 = vpow2.f32 %v1280_v25  ;;  %v1250_v36 = vmul.f32 -1.442695, %v2054_v32  ;;  %v1282_v37 = vmul.f32 -1.442695, %v2057_v33  ;;  %v1388_v38 = vpop.f32.mrb[6].mxu0  ;;  %v1436_v39 = vpop.f32.mrb[6].mxu1 }
  0xe5   :  { %1491 = vpow2.f32 %v1251_v34  ;;  %v2064_v40 = vadd.f32 %v1388_v38, %v2013_v1  ;;  %v375_v41 = vpop.f32.mrb[7].mxu0  ;;  %v535_v42 = vpop.f32.mrb[7].mxu1  ;;  %v2070_v10 = vadd.f32 %v1436_v39, %v2013_v1 }
  0xe6   :  { %1493 = vpow2.f32 %v1283_v35  ;;  %v2073_v13 = vadd.f32 %v2013_v1, %v375_v41  ;;  %v2078_v19 = vadd.f32 %v2013_v1, %v535_v42 }
  0xe7   :  { %v1476_v43 = vpop.eup %1475  ;;  %1495 = vpow2.f32 %v1250_v36  ;;  %v1253_v44 = vmul.f32 -1.442695, %v2064_v40  ;;  %v1285_v34 = vmul.f32 -1.442695, %v2070_v10 }
  0xe8   :  { %v1478_v45 = vpop.eup %1477  ;;  %v857_v46 = vadd.f32 1.0, %v1476_v43  ;;  %1497 = vpow2.f32 %v1282_v37  ;;  %v1391_v47 = vpop.f32.mrb[8].mxu0  ;;  %v1252_v38 = vmul.f32 -1.442695, %v2073_v13 }
  0xe9   :  { %v1480_v48 = vpop.eup %1479  ;;  %v889_v49 = vadd.f32 1.0, %v1478_v45  ;;  %1499 = vpow2.f32 %v1253_v44  ;;  %v1439_v50 = vpop.f32.mrb[8].mxu1  ;;  %v2085_v26 = vadd.f32 %v1391_v47, %v2013_v1  ;;  %v1284_v44 = vmul.f32 -1.442695, %v2078_v19 }
  0xea   :  { %v385_v51 = vpop.f32.mrb[9].mxu0  ;;  %v1482_v52 = vpop.eup %1481  ;;  %1501 = vrcp.f32 %v857_v46  ;;  %v856_v53 = vadd.f32 1.0, %v1480_v48  ;;  %v2091_v35 = vadd.f32 %v1439_v50, %v2013_v1 }
  0xeb   :  { %v545_v54 = vpop.f32.mrb[9].mxu1  ;;  %v1484_v55 = vpop.eup %1483  ;;  %1503 = vrcp.f32 %v889_v49  ;;  %v888_v56 = vadd.f32 1.0, %v1482_v52  ;;  %v2095_v39 = vadd.f32 %v2013_v1, %v385_v51  ;;  %v1255_v50 = vmul.f32 -1.442695, %v2085_v26 }
  0xec   :  { %v1486_v57 = vpop.eup %1485  ;;  %1505 = vrcp.f32 %v856_v53  ;;  %v859_v58 = vadd.f32 1.0, %v1484_v55  ;;  %v1394_v59 = vpop.f32.mrb[10].mxu0  ;;  %v2102_v45 = vadd.f32 %v2013_v1, %v545_v54  ;;  %v1287_v54 = vmul.f32 -1.442695, %v2091_v35 }
  0xed   :  { %v1488_v60 = vpop.eup %1487  ;;  %1507 = vrcp.f32 %v888_v56  ;;  %v891_v61 = vadd.f32 1.0, %v1486_v57  ;;  %v1442_v62 = vpop.f32.mrb[10].mxu1  ;;  %v2111_v51 = vadd.f32 %v1394_v59, %v2013_v1  ;;  %v1254_v57 = vmul.f32 -1.442695, %v2095_v39 }
  0xee   :  { %v395_v63 = vpop.f32.mrb[11].mxu0  ;;  %v1490_v0 = vpop.eup %1489  ;;  %1509 = vrcp.f32 %v859_v58  ;;  %v858_v2 = vadd.f32 1.0, %v1488_v60 }
  0xef   :  { %v2067_v3 = vpop.f32.mrb[11].mxu1  ;;  %v1492_v6 = vpop.eup %1491  ;;  %1511 = vrcp.f32 %v891_v61  ;;  %v890_v7 = vadd.f32 1.0, %v1490_v0  ;;  %v2131_v58 = vadd.f32 %v2013_v1, %v395_v63 }
  0xf0   :  { %v1494_v11 = vpop.eup %1493  ;;  %1513 = vrcp.f32 %v858_v2  ;;  %v861_v12 = vadd.f32 1.0, %v1492_v6  ;;  %v2075_v14 = vpop.f32.mrb[12].mxu0 }
  0xf1   :  { %v1496_v15 = vpop.eup %1495  ;;  %1515 = vrcp.f32 %v890_v7  ;;  %v893_v18 = vadd.f32 1.0, %v1494_v11  ;;  %v2080_v22 = vpop.f32.mrb[12].mxu1  ;;  %v2159_v7 = vadd.f32 %v2075_v14, %v2013_v1 }
  0xf2   :  { %v2082_v23 = vpop.f32.mrb[13].mxu0  ;;  %v1498_v24 = vpop.eup %1497  ;;  %1517 = vrcp.f32 %v861_v12  ;;  %v860_v25 = vadd.f32 1.0, %v1496_v15 }
  0xf3   :  { %v2087_v27 = vpop.f32.mrb[13].mxu1  ;;  %v1500_v30 = vpop.eup %1499  ;;  %1519 = vrcp.f32 %v893_v18  ;;  %v892_v31 = vadd.f32 1.0, %v1498_v24  ;;  %v1256_v18 = vmul.f32 -1.442695, %v2131_v58 }
  0xf4   :  { %v1502_v36 = vpop.eup %1501  ;;  %1521 = vrcp.f32 %v860_v25  ;;  %v863_v37 = vadd.f32 1.0, %v1500_v30  ;;  %v2097_v41 = vpop.f32.mrb[14].mxu0 }
  0xf5   :  { %v1504_v42 = vpop.eup %1503  ;;  %v1049_v43 = vmul.f32 %v1502_v36, %v2016_v4  ;;  %1523 = vrcp.f32 %v892_v31  ;;  %v2104_v46 = vpop.f32.mrb[14].mxu1 }
  0xf6   :  { %v2106_v47 = vpop.f32.mrb[15].mxu0  ;;  %v1506_v48 = vpop.eup %1505  ;;  %v1081_v49 = vmul.f32 %v1504_v42, %v2019_v5  ;;  %1525 = vrcp.f32 %v863_v37  ;;  %v2122_v5 = vadd.f32 %v1442_v62, %v2013_v1  ;;  %v2145_v62 = vadd.f32 %v2013_v1, %v2067_v3 }
  0xf7   :  { %v2113_v4 = vpop.f32.mrb[15].mxu1  ;;  %v1508_v52 = vpop.eup %1507  ;;  %1114 = vst.msk [vmem:[%s2657_s3 + $0x8] sm:$0xff] %vm1112_vm1, %v1049_v43  ;;  %v1048_v53 = vmul.f32 %v1506_v48, %v2022_v8  ;;  %1527 = vpow2.f32 %v1285_v34 }
  0xf8   :  { %v1510_v55 = vpop.eup %1509  ;;  %1146 = vst.msk [vmem:[%s2657_s3 + $0x108] sm:$0xff] %vm1112_vm1, %v1081_v49  ;;  %v1080_v56 = vmul.f32 %v1508_v52, %v2025_v9  ;;  %1529 = vpow2.f32 %v1252_v38  ;;  %v2133_v8 = vpop.f32.mrb[16].mxu0  ;;  %v1286_v9 = vmul.f32 -1.442695, %v2102_v45  ;;  %v1289_v12 = vmul.f32 -1.442695, %v2122_v5 }
  0xf9   :  { %v2135_v59 = vpop.f32.mrb[16].mxu1  ;;  %v1512_v60 = vpop.eup %1511  ;;  %1113 = vst.msk [vmem:[%s2657_s3] sm:$0xff] %vm1112_vm1, %v1048_v53  ;;  %v1051_v61 = vmul.f32 %v1510_v55, %v2032_v16  ;;  %1531 = vpow2.f32 %v1284_v44  ;;  %v1257_v16 = vmul.f32 -1.442695, %v2111_v51  ;;  %v1288_v30 = vmul.f32 -1.442695, %v2145_v62 }
  0xfa   :  { %v2147_v63 = vpop.f32.mrb[17].mxu0  ;;  %v2149_v0 = vpop.f32.mrb[17].mxu1  ;;  %1145 = vst.msk [vmem:[%s2657_s3 + $0x100] sm:$0xff] %vm1112_vm1, %v1080_v56  ;;  %v1083_v6 = vmul.f32 %v1512_v60, %v2035_v17  ;;  %1533 = vpow2.f32 %v1255_v50  ;;  %v2169_v17 = vadd.f32 %v2080_v22, %v2013_v1  ;;  %v2216_v49 = vadd.f32 %v2013_v1, %v2087_v27 }
  0xfb   :  { %v1514_v2 = vpop.eup %1513  ;;  %1116 = vst.msk [vmem:[%s2657_s3 + $0x18] sm:$0xff] %vm1112_vm1, %v1051_v61  ;;  %1535 = vpow2.f32 %v1287_v54 }
  0xfc   :  { %v1516_v3 = vpop.eup %1515  ;;  %v1050_v11 = vmul.f32 %v1514_v2, %v2038_v20  ;;  %1148 = vst.msk [vmem:[%s2657_s3 + $0x118] sm:$0xff] %vm1112_vm1, %v1083_v6  ;;  %1537 = vpow2.f32 %v1254_v57  ;;  %v2177_v24 = vpop.f32.mrb[18].mxu0  ;;  %v1291_v43 = vmul.f32 -1.442695, %v2169_v17 }
  0xfd   :  { %v1518_v15 = vpop.eup %1517  ;;  %v1082_v14 = vmul.f32 %v1516_v3, %v2041_v21  ;;  %v2179_v20 = vpop.f32.mrb[18].mxu1  ;;  %1539 = vpow2.f32 %v1286_v9  ;;  %v2189_v21 = vadd.f32 %v2013_v1, %v2082_v23  ;;  %v2247_v3 = vmul.f32 -1.442695, %v2216_v49 }
  0xfe   :  { %v1520_v25 = vpop.eup %1519  ;;  %1115 = vst.msk [vmem:[%s2657_s3 + $0x10] sm:$0xff] %vm1112_vm1, %v1050_v11  ;;  %v1053_v22 = vmul.f32 %v1518_v15, %v2048_v28  ;;  %v435_v31 = vpop.f32.mrb[19].mxu0  ;;  %1541 = vpow2.f32 %v1257_v16  ;;  %v1259_v28 = vmul.f32 -1.442695, %v2159_v7  ;;  %v2251_v11 = vadd.f32 %v2097_v41, %v2013_v1 }
  0xff   :  { %v595_v34 = vpop.f32.mrb[19].mxu1  ;;  %v1522_v36 = vpop.eup %1521  ;;  %1147 = vst.msk [vmem:[%s2657_s3 + $0x110] sm:$0xff] %vm1112_vm1, %v1082_v14  ;;  %v1085_v37 = vmul.f32 %v1520_v25, %v2051_v29  ;;  %v2198_v38 = vadd.f32 %v2013_v1, %v435_v31  ;;  %1543 = vpow2.f32 %v1289_v12  ;;  %v2241_v9 = vmul.f32 -1.442695, %v2189_v21 }
 0x100   :  { %v1524_v42 = vpop.eup %1523  ;;  %1118 = vst.msk [vmem:[%s2657_s3 + $0x28] sm:$0xff] %vm1112_vm1, %v1053_v22  ;;  %v1052_v23 = vmul.f32 %v1522_v36, %v2054_v32  ;;  %v2207_v44 = vadd.f32 %v2013_v1, %v595_v34  ;;  %1545 = vpow2.f32 %v1256_v18  ;;  %v1409_v32 = vpop.f32.mrb[20].mxu0  ;;  %v2255_v18 = vadd.f32 %v2104_v46, %v2013_v1 }
 0x101   :  { %v1526_v29 = vpop.eup %1525  ;;  %1150 = vst.msk [vmem:[%s2657_s3 + $0x128] sm:$0xff] %vm1112_vm1, %v1085_v37  ;;  %v1084_v48 = vmul.f32 %v1524_v42, %v2057_v33  ;;  %v1457_v50 = vpop.f32.mrb[20].mxu1  ;;  %1547 = vpow2.f32 %v1288_v30  ;;  %v2224_v54 = vadd.f32 %v1409_v32, %v2013_v1  ;;  %v2268_v46 = vadd.f32 %v2013_v1, %v2106_v47 }
 0x102   :  { %v1528_v52 = vpop.eup %1527  ;;  %1117 = vst.msk [vmem:[%s2657_s3 + $0x20] sm:$0xff] %vm1112_vm1, %v1052_v23  ;;  %v1055_v53 = vmul.f32 %v1526_v29, %v2064_v40  ;;  %v445_v33 = vpop.f32.mrb[21].mxu0  ;;  %1549 = vpow2.f32 %v1259_v28  ;;  %v2231_v57 = vadd.f32 %v1457_v50, %v2013_v1  ;;  %v2278_v32 = vadd.f32 %v2013_v1, %v2113_v4 }
 0x103   :  { %v605_v55 = vpop.f32.mrb[21].mxu1  ;;  %v1530_v56 = vpop.eup %1529  ;;  %1149 = vst.msk [vmem:[%s2657_s3 + $0x120] sm:$0xff] %vm1112_vm1, %v1084_v48  ;;  %v895_v27 = vadd.f32 1.0, %v1528_v52  ;;  %v2234_v60 = vadd.f32 %v2013_v1, %v445_v33  ;;  %1551 = vpow2.f32 %v1291_v43  ;;  %v2274_v48 = vmul.f32 -1.442695, %v2251_v11 }
 0x104   :  { %v1532_v40 = vpop.eup %1531  ;;  %1120 = vst.msk [vmem:[%s2657_s3 + $0x38] sm:$0xff] %vm1112_vm1, %v1055_v53  ;;  %v862_v61 = vadd.f32 1.0, %v1530_v56  ;;  %v2244_v2 = vadd.f32 %v2013_v1, %v605_v55  ;;  %v1412_v12 = vpop.f32.mrb[22].mxu0  ;;  %v2281_v47 = vmul.f32 -1.442695, %v2255_v18 }
 0x105   :  { %v1534_v6 = vpop.eup %1533  ;;  %1553 = vrcp.f32 %v895_v27  ;;  %v894_v16 = vadd.f32 1.0, %v1532_v40  ;;  %v2258_v25 = vadd.f32 %v1412_v12, %v2013_v1  ;;  %v1460_v22 = vpop.f32.mrb[22].mxu1 }
 0x106   :  { %v1536_v15 = vpop.eup %1535  ;;  %1555 = vrcp.f32 %v862_v61  ;;  %v865_v14 = vadd.f32 1.0, %v1534_v6  ;;  %v455_v30 = vpop.f32.mrb[23].mxu0  ;;  %v2261_v36 = vadd.f32 %v1460_v22, %v2013_v1 }
 0x107   :  { %v1538_v31 = vpop.eup %1537  ;;  %1557 = vrcp.f32 %v894_v16  ;;  %v897_v34 = vadd.f32 1.0, %v1536_v15  ;;  %v2264_v41 = vadd.f32 %v2013_v1, %v455_v30  ;;  %v615_v37 = vpop.f32.mrb[23].mxu1  ;;  %v2293_v15 = vmul.f32 -1.442695, %v2268_v46 }
 0x108   :  { %v1540_v28 = vpop.eup %1539  ;;  %1559 = vrcp.f32 %v865_v14  ;;  %v864_v42 = vadd.f32 1.0, %v1538_v31  ;;  %v2271_v23 = vadd.f32 %v2013_v1, %v615_v37  ;;  %v1415_v50 = vpop.f32.mrb[24].mxu0  ;;  %v2299_v31 = vmul.f32 -1.442695, %v2278_v32 }
 0x109   :  { %v1542_v43 = vpop.eup %1541  ;;  %1561 = vrcp.f32 %v897_v34  ;;  %v896_v29 = vadd.f32 1.0, %v1540_v28  ;;  %v2284_v33 = vadd.f32 %v1415_v50, %v2013_v1  ;;  %v1463_v55 = vpop.f32.mrb[24].mxu1  ;;  %v2303_v34 = vadd.f32 %v2133_v8, %v2013_v1 }
 0x10a   :  { %v1544_v52 = vpop.eup %1543  ;;  %1563 = vrcp.f32 %v864_v42  ;;  %v867_v53 = vadd.f32 1.0, %v1542_v43  ;;  %v465_v56 = vpop.f32.mrb[25].mxu0  ;;  %v2287_v61 = vadd.f32 %v1463_v55, %v2013_v1  ;;  %v2307_v43 = vadd.f32 %v2135_v59, %v2013_v1 }
 0x10b   :  { %v1546_v27 = vpop.eup %1545  ;;  %1565 = vrcp.f32 %v896_v29  ;;  %v899_v40 = vadd.f32 1.0, %v1544_v52  ;;  %v2290_v4 = vadd.f32 %v2013_v1, %v465_v56  ;;  %v625_v6 = vpop.f32.mrb[25].mxu1  ;;  %v2321_v59 = vadd.f32 %v2013_v1, %v2147_v63 }
 0x10c   :  { %v1548_v16 = vpop.eup %1547  ;;  %1567 = vrcp.f32 %v867_v53  ;;  %v866_v12 = vadd.f32 1.0, %v1546_v27  ;;  %v2296_v14 = vadd.f32 %v2013_v1, %v625_v6  ;;  %v1418_v37 = vpop.f32.mrb[26].mxu0 }
 0x10d   :  { %v1550_v22 = vpop.eup %1549  ;;  %1569 = vrcp.f32 %v899_v40  ;;  %v898_v30 = vadd.f32 1.0, %v1548_v16  ;;  %v2310_v29 = vadd.f32 %v1418_v37, %v2013_v1  ;;  %v1466_v50 = vpop.f32.mrb[26].mxu1  ;;  %v2330_v37 = vadd.f32 %v2013_v1, %v2149_v0 }
 0x10e   :  { %v1552_v28 = vpop.eup %1551  ;;  %1571 = vrcp.f32 %v866_v12  ;;  %v869_v42 = vadd.f32 1.0, %v1550_v22  ;;  %v475_v52 = vpop.f32.mrb[27].mxu0  ;;  %v2313_v56 = vadd.f32 %v1466_v50, %v2013_v1 }
 0x10f   :  { %v1554_v53 = vpop.eup %1553  ;;  %1573 = vrcp.f32 %v898_v30  ;;  %v901_v55 = vadd.f32 1.0, %v1552_v28  ;;  %v2316_v8 = vadd.f32 %v2013_v1, %v475_v52  ;;  %v635_v27 = vpop.f32.mrb[27].mxu1  ;;  %v1263_v30 = vmul.f32 -1.442695, %v2303_v34 }
 0x110   :  { %v1556_v40 = vpop.eup %1555  ;;  %v1087_v6 = vmul.f32 %v1554_v53, %v2070_v10  ;;  %1575 = vrcp.f32 %v869_v42  ;;  %v2324_v16 = vadd.f32 %v2013_v1, %v635_v27  ;;  %v1421_v28 = vpop.f32.mrb[28].mxu0 }
 0x111   :  { %v1558_v12 = vpop.eup %1557  ;;  %v1054_v22 = vmul.f32 %v1556_v40, %v2073_v13  ;;  %1577 = vrcp.f32 %v901_v55  ;;  %v1469_v10 = vpop.f32.mrb[28].mxu1  ;;  %v1295_v13 = vmul.f32 -1.442695, %v2307_v43  ;;  %v2340_v50 = vadd.f32 %v1421_v28, %v2013_v1 }
 0x112   :  { %v1560_v42 = vpop.eup %1559  ;;  %1152 = vst.msk [vmem:[%s2657_s3 + $0x138] sm:$0xff] %vm1112_vm1, %v1087_v6  ;;  %v1086_v63 = vmul.f32 %v1558_v12, %v2078_v19  ;;  %1579 = vpow2.f32 %v2241_v9  ;;  %v485_v52 = vpop.f32.mrb[29].mxu0  ;;  %v2349_v19 = vadd.f32 %v1469_v10, %v2013_v1 }
 0x113   :  { %v645_v0 = vpop.f32.mrb[29].mxu1  ;;  %v1562_v53 = vpop.eup %1561  ;;  %1119 = vst.msk [vmem:[%s2657_s3 + $0x30] sm:$0xff] %vm1112_vm1, %v1054_v22  ;;  %v1057_v55 = vmul.f32 %v1560_v42, %v2085_v26  ;;  %1581 = vpow2.f32 %v2247_v3  ;;  %v2352_v9 = vadd.f32 %v2013_v1, %v485_v52  ;;  %v2362_v26 = vadd.f32 %v2177_v24, %v2013_v1 }
 0x114   :  { %v1564_v27 = vpop.eup %1563  ;;  %1151 = vst.msk [vmem:[%s2657_s3 + $0x130] sm:$0xff] %vm1112_vm1, %v1086_v63  ;;  %v1089_v40 = vmul.f32 %v1562_v53, %v2091_v35  ;;  %1583 = vpow2.f32 %v2274_v48  ;;  %v2365_v3 = vadd.f32 %v2013_v1, %v645_v0  ;;  %v1262_v35 = vmul.f32 -1.442695, %v2321_v59  ;;  %v1424_v24 = vpop.f32.mrb[30].mxu0 }
 0x115   :  { %v1566_v6 = vpop.eup %1565  ;;  %1122 = vst.msk [vmem:[%s2657_s3 + $0x48] sm:$0xff] %vm1112_vm1, %v1057_v55  ;;  %v1056_v12 = vmul.f32 %v1564_v27, %v2095_v39  ;;  %1585 = vpow2.f32 %v2281_v47  ;;  %v2376_v48 = vadd.f32 %v2179_v20, %v2013_v1  ;;  %v1472_v22 = vpop.f32.mrb[30].mxu1  ;;  %v1294_v39 = vmul.f32 -1.442695, %v2330_v37 }
 0x116   :  { %v1568_v28 = vpop.eup %1567  ;;  %1154 = vst.msk [vmem:[%s2657_s3 + $0x148] sm:$0xff] %vm1112_vm1, %v1089_v40  ;;  %v1088_v10 = vmul.f32 %v1566_v6, %v2102_v45  ;;  %1587 = vpow2.f32 %v2293_v15  ;;  %v2386_v47 = vadd.f32 %v1424_v24, %v2013_v1  ;;  %v495_v42 = vpop.f32.mrb[31].mxu0  ;;  %v2395_v45 = vadd.f32 %v1472_v22, %v2013_v1 }
 0x117   :  { %v655_v20 = vpop.f32.mrb[31].mxu1  ;;  %v1570_v63 = vpop.eup %1569  ;;  %1121 = vst.msk [vmem:[%s2657_s3 + $0x40] sm:$0xff] %vm1112_vm1, %v1056_v12  ;;  %v1059_v52 = vmul.f32 %v1568_v28, %v2111_v51  ;;  %1589 = vpow2.f32 %v2299_v31  ;;  %v2398_v15 = vadd.f32 %v2013_v1, %v495_v42  ;;  %v1265_v55 = vmul.f32 -1.442695, %v2362_v26 }
 0x118   :  { %v1572_v0 = vpop.eup %1571  ;;  %1153 = vst.msk [vmem:[%s2657_s3 + $0x140] sm:$0xff] %vm1112_vm1, %v1088_v10  ;;  %v1091_v53 = vmul.f32 %v1570_v63, %v2122_v5  ;;  %1591 = vpow2.f32 %v1263_v30  ;;  %v2407_v51 = vadd.f32 %v2013_v1, %v655_v20  ;;  %v1297_v40 = vmul.f32 -1.442695, %v2376_v48 }
 0x119   :  { %v1574_v31 = vpop.eup %1573  ;;  %1124 = vst.msk [vmem:[%s2657_s3 + $0x58] sm:$0xff] %vm1112_vm1, %v1059_v52  ;;  %v1058_v27 = vmul.f32 %v1572_v0, %v2131_v58  ;;  %1593 = vpow2.f32 %v1295_v13  ;;  %v1264_v5 = vmul.f32 -1.442695, %v2198_v38 }
 0x11a   :  { %v1576_v6 = vpop.eup %1575  ;;  %1156 = vst.msk [vmem:[%s2657_s3 + $0x158] sm:$0xff] %vm1112_vm1, %v1091_v53  ;;  %v1090_v1 = vmul.f32 %v1574_v31, %v2145_v62  ;;  %1595 = vpow2.f32 %v1262_v35 }
 0x11b   :  { %v1578_v30 = vpop.eup %1577  ;;  %1123 = vst.msk [vmem:[%s2657_s3 + $0x50] sm:$0xff] %vm1112_vm1, %v1058_v27  ;;  %v1061_v58 = vmul.f32 %v1576_v6, %v2159_v7  ;;  %1597 = vpow2.f32 %v1294_v39 }
 0x11c   :  { %v1580_v13 = vpop.eup %1579  ;;  %1155 = vst.msk [vmem:[%s2657_s3 + $0x150] sm:$0xff] %vm1112_vm1, %v1090_v1  ;;  %v1093_v62 = vmul.f32 %v1578_v30, %v2169_v17  ;;  %1599 = vpow2.f32 %v1265_v55 }
 0x11d   :  { %v1582_v12 = vpop.eup %1581  ;;  %1126 = vst.msk [vmem:[%s2657_s3 + $0x68] sm:$0xff] %vm1112_vm1, %v1061_v58  ;;  %v868_v35 = vadd.f32 1.0, %v1580_v13  ;;  %1601 = vpow2.f32 %v1297_v40  ;;  %v1296_v13 = vmul.f32 -1.442695, %v2207_v44 }
 0x11e   :  { %v1584_v24 = vpop.eup %1583  ;;  %1158 = vst.msk [vmem:[%s2657_s3 + $0x168] sm:$0xff] %vm1112_vm1, %v1093_v62  ;;  %v900_v7 = vadd.f32 1.0, %v1582_v12  ;;  %1603 = vpow2.f32 %v1264_v5 }
 0x11f   :  { %v1586_v22 = vpop.eup %1585  ;;  %1605 = vrcp.f32 %v868_v35  ;;  %v871_v17 = vadd.f32 1.0, %v1584_v24  ;;  %v1267_v35 = vmul.f32 -1.442695, %v2224_v54 }
 0x120   :  { %v1588_v28 = vpop.eup %1587  ;;  %1607 = vrcp.f32 %v900_v7  ;;  %v903_v10 = vadd.f32 1.0, %v1586_v22  ;;  %v1299_v22 = vmul.f32 -1.442695, %v2231_v57 }
 0x121   :  { %v1590_v39 = vpop.eup %1589  ;;  %1609 = vrcp.f32 %v871_v17  ;;  %v870_v42 = vadd.f32 1.0, %v1588_v28 }
 0x122   :  { %v1592_v20 = vpop.eup %1591  ;;  %1611 = vrcp.f32 %v903_v10  ;;  %v902_v63 = vadd.f32 1.0, %v1590_v39  ;;  %v1266_v10 = vmul.f32 -1.442695, %v2234_v60 }
 0x123   :  { %v1594_v52 = vpop.eup %1593  ;;  %1613 = vrcp.f32 %v870_v42  ;;  %v873_v0 = vadd.f32 1.0, %v1592_v20 }
 0x124   :  { %v1596_v53 = vpop.eup %1595  ;;  %1615 = vrcp.f32 %v902_v63  ;;  %v905_v55 = vadd.f32 1.0, %v1594_v52  ;;  %v1269_v63 = vmul.f32 -1.442695, %v2258_v25 }
 0x125   :  { %v1598_v31 = vpop.eup %1597  ;;  %1617 = vrcp.f32 %v873_v0  ;;  %v872_v27 = vadd.f32 1.0, %v1596_v53  ;;  %v1301_v0 = vmul.f32 -1.442695, %v2261_v36 }
 0x126   :  { %v1600_v40 = vpop.eup %1599  ;;  %1619 = vrcp.f32 %v905_v55  ;;  %v904_v6 = vadd.f32 1.0, %v1598_v31  ;;  %v1268_v55 = vmul.f32 -1.442695, %v2264_v41 }
 0x127   :  { %v1602_v1 = vpop.eup %1601  ;;  %1621 = vrcp.f32 %v872_v27  ;;  %v875_v5 = vadd.f32 1.0, %v1600_v40  ;;  %v1300_v27 = vmul.f32 -1.442695, %v2271_v23 }
 0x128   :  { %v1604_v30 = vpop.eup %1603  ;;  %1623 = vrcp.f32 %v904_v6  ;;  %v907_v58 = vadd.f32 1.0, %v1602_v1  ;;  %v1271_v6 = vmul.f32 -1.442695, %v2284_v33 }
 0x129   :  { %v1606_v62 = vpop.eup %1605  ;;  %1625 = vrcp.f32 %v875_v5  ;;  %v874_v12 = vadd.f32 1.0, %v1604_v30  ;;  %v1303_v5 = vmul.f32 -1.442695, %v2287_v61 }
 0x12a   :  { %v1608_v24 = vpop.eup %1607  ;;  %v1060_v7 = vmul.f32 %v1606_v62, %v2189_v21  ;;  %1627 = vrcp.f32 %v907_v58  ;;  %v1298_v21 = vmul.f32 -1.442695, %v2244_v2  ;;  %v1270_v58 = vmul.f32 -1.442695, %v2290_v4 }
 0x12b   :  { %v1610_v17 = vpop.eup %1609  ;;  %v1092_v28 = vmul.f32 %v1608_v24, %v2216_v49  ;;  %1629 = vrcp.f32 %v874_v12  ;;  %v1302_v62 = vmul.f32 -1.442695, %v2296_v14 }
 0x12c   :  { %v1612_v39 = vpop.eup %1611  ;;  %1125 = vst.msk [vmem:[%s2657_s3 + $0x60] sm:$0xff] %vm1112_vm1, %v1060_v7  ;;  %v1063_v42 = vmul.f32 %v1610_v17, %v2251_v11  ;;  %1631 = vpow2.f32 %v1296_v13 }
 0x12d   :  { %v1614_v20 = vpop.eup %1613  ;;  %1157 = vst.msk [vmem:[%s2657_s3 + $0x160] sm:$0xff] %vm1112_vm1, %v1092_v28  ;;  %v1095_v49 = vmul.f32 %v1612_v39, %v2255_v18  ;;  %1633 = vpow2.f32 %v1267_v35 }
 0x12e   :  { %v1616_v52 = vpop.eup %1615  ;;  %1128 = vst.msk [vmem:[%s2657_s3 + $0x78] sm:$0xff] %vm1112_vm1, %v1063_v42  ;;  %v1062_v11 = vmul.f32 %v1614_v20, %v2268_v46  ;;  %1635 = vpow2.f32 %v1299_v22 }
 0x12f   :  { %v1618_v53 = vpop.eup %1617  ;;  %1160 = vst.msk [vmem:[%s2657_s3 + $0x178] sm:$0xff] %vm1112_vm1, %v1095_v49  ;;  %v1094_v18 = vmul.f32 %v1616_v52, %v2278_v32  ;;  %1637 = vpow2.f32 %v1266_v10 }
 0x130   :  { %v1620_v31 = vpop.eup %1619  ;;  %1127 = vst.msk [vmem:[%s2657_s3 + $0x70] sm:$0xff] %vm1112_vm1, %v1062_v11  ;;  %v1065_v46 = vmul.f32 %v1618_v53, %v2303_v34  ;;  %1639 = vpow2.f32 %v1298_v21 }
 0x131   :  { %v1622_v40 = vpop.eup %1621  ;;  %1159 = vst.msk [vmem:[%s2657_s3 + $0x170] sm:$0xff] %vm1112_vm1, %v1094_v18  ;;  %v1097_v32 = vmul.f32 %v1620_v31, %v2307_v43  ;;  %1641 = vpow2.f32 %v1269_v63 }
 0x132   :  { %v1624_v1 = vpop.eup %1623  ;;  %1130 = vst.msk [vmem:[%s2657_s3 + $0x88] sm:$0xff] %vm1112_vm1, %v1065_v46  ;;  %v1064_v34 = vmul.f32 %v1622_v40, %v2321_v59  ;;  %1643 = vpow2.f32 %v1301_v0 }
 0x133   :  { %v1626_v30 = vpop.eup %1625  ;;  %1162 = vst.msk [vmem:[%s2657_s3 + $0x188] sm:$0xff] %vm1112_vm1, %v1097_v32  ;;  %v1096_v43 = vmul.f32 %v1624_v1, %v2330_v37  ;;  %1645 = vpow2.f32 %v1268_v55  ;;  %v1273_v32 = vmul.f32 -1.442695, %v2310_v29 }
 0x134   :  { %v1628_v13 = vpop.eup %1627  ;;  %1129 = vst.msk [vmem:[%s2657_s3 + $0x80] sm:$0xff] %vm1112_vm1, %v1064_v34  ;;  %v1067_v59 = vmul.f32 %v1626_v30, %v2362_v26  ;;  %1647 = vpow2.f32 %v1300_v27  ;;  %v1305_v34 = vmul.f32 -1.442695, %v2313_v56 }
 0x135   :  { %v1630_v12 = vpop.eup %1629  ;;  %1161 = vst.msk [vmem:[%s2657_s3 + $0x180] sm:$0xff] %vm1112_vm1, %v1096_v43  ;;  %v1099_v37 = vmul.f32 %v1628_v13, %v2376_v48  ;;  %1649 = vpow2.f32 %v1271_v6  ;;  %v1272_v43 = vmul.f32 -1.442695, %v2316_v8 }
 0x136   :  { %v1632_v35 = vpop.eup %1631  ;;  %1132 = vst.msk [vmem:[%s2657_s3 + $0x98] sm:$0xff] %vm1112_vm1, %v1067_v59  ;;  %v1066_v26 = vmul.f32 %v1630_v12, %v2198_v38  ;;  %1651 = vpow2.f32 %v1303_v5  ;;  %v1304_v59 = vmul.f32 -1.442695, %v2324_v16 }
 0x137   :  { %v1634_v24 = vpop.eup %1633  ;;  %1164 = vst.msk [vmem:[%s2657_s3 + $0x198] sm:$0xff] %vm1112_vm1, %v1099_v37  ;;  %v906_v7 = vadd.f32 1.0, %v1632_v35  ;;  %1653 = vpow2.f32 %v1270_v58  ;;  %v1307_v35 = vmul.f32 -1.442695, %v2349_v19 }
 0x138   :  { %v1636_v22 = vpop.eup %1635  ;;  %1131 = vst.msk [vmem:[%s2657_s3 + $0x90] sm:$0xff] %vm1112_vm1, %v1066_v26  ;;  %v877_v48 = vadd.f32 1.0, %v1634_v24  ;;  %1655 = vpow2.f32 %v1302_v62  ;;  %v1274_v24 = vmul.f32 -1.442695, %v2352_v9 }
 0x139   :  { %v1638_v17 = vpop.eup %1637  ;;  %1657 = vrcp.f32 %v906_v7  ;;  %v909_v38 = vadd.f32 1.0, %v1636_v22  ;;  %v1306_v22 = vmul.f32 -1.442695, %v2365_v3 }
 0x13a   :  { %v1640_v28 = vpop.eup %1639  ;;  %1659 = vrcp.f32 %v877_v48  ;;  %v876_v10 = vadd.f32 1.0, %v1638_v17  ;;  %v1277_v17 = vmul.f32 -1.442695, %v2386_v47 }
 0x13b   :  { %v1642_v39 = vpop.eup %1641  ;;  %1661 = vrcp.f32 %v909_v38  ;;  %v908_v42 = vadd.f32 1.0, %v1640_v28  ;;  %v1309_v28 = vmul.f32 -1.442695, %v2395_v45 }
 0x13c   :  { %v1644_v21 = vpop.eup %1643  ;;  %1663 = vrcp.f32 %v876_v10  ;;  %v879_v20 = vadd.f32 1.0, %v1642_v39  ;;  %v1276_v39 = vmul.f32 -1.442695, %v2398_v15 }
 0x13d   :  { %v1646_v49 = vpop.eup %1645  ;;  %1665 = vrcp.f32 %v908_v42  ;;  %v911_v63 = vadd.f32 1.0, %v1644_v21  ;;  %v1308_v21 = vmul.f32 -1.442695, %v2407_v51 }
 0x13e   :  { %v1648_v52 = vpop.eup %1647  ;;  %1667 = vrcp.f32 %v879_v20  ;;  %v878_v11 = vadd.f32 1.0, %v1646_v49 }
 0x13f   :  { %v1650_v0 = vpop.eup %1649  ;;  %1669 = vrcp.f32 %v911_v63  ;;  %v910_v53 = vadd.f32 1.0, %v1648_v52 }
 0x140   :  { %v1652_v18 = vpop.eup %1651  ;;  %1671 = vrcp.f32 %v878_v11  ;;  %v881_v55 = vadd.f32 1.0, %v1650_v0 }
 0x141   :  { %v1654_v31 = vpop.eup %1653  ;;  %1673 = vrcp.f32 %v910_v53  ;;  %v913_v46 = vadd.f32 1.0, %v1652_v18 }
 0x142   :  { %v1656_v27 = vpop.eup %1655  ;;  %1675 = vrcp.f32 %v881_v55  ;;  %v880_v40 = vadd.f32 1.0, %v1654_v31 }
 0x143   :  { %v1658_v6 = vpop.eup %1657  ;;  %1677 = vrcp.f32 %v913_v46  ;;  %v912_v1 = vadd.f32 1.0, %v1656_v27 }
 0x144   :  { %v1660_v5 = vpop.eup %1659  ;;  %v1098_v30 = vmul.f32 %v1658_v6, %v2207_v44  ;;  %1679 = vrcp.f32 %v880_v40  ;;  %v1275_v44 = vmul.f32 -1.442695, %v2340_v50 }
 0x145   :  { %v1662_v58 = vpop.eup %1661  ;;  %v1069_v13 = vmul.f32 %v1660_v5, %v2224_v54  ;;  %1681 = vrcp.f32 %v912_v1 }
 0x146   :  { %v1664_v62 = vpop.eup %1663  ;;  %1163 = vst.msk [vmem:[%s2657_s3 + $0x190] sm:$0xff] %vm1112_vm1, %v1098_v30  ;;  %v1101_v12 = vmul.f32 %v1662_v58, %v2231_v57  ;;  %1683 = vpow2.f32 %v1273_v32 }
 0x147   :  { %v1666_v37 = vpop.eup %1665  ;;  %1134 = vst.msk [vmem:[%s2657_s3 + $0xa8] sm:$0xff] %vm1112_vm1, %v1069_v13  ;;  %v1068_v54 = vmul.f32 %v1664_v62, %v2234_v60  ;;  %1685 = vpow2.f32 %v1305_v34 }
 0x148   :  { %v1668_v26 = vpop.eup %1667  ;;  %1166 = vst.msk [vmem:[%s2657_s3 + $0x1a8] sm:$0xff] %vm1112_vm1, %v1101_v12  ;;  %v1100_v57 = vmul.f32 %v1666_v37, %v2244_v2  ;;  %1687 = vpow2.f32 %v1272_v43 }
 0x149   :  { %v1670_v7 = vpop.eup %1669  ;;  %1133 = vst.msk [vmem:[%s2657_s3 + $0xa0] sm:$0xff] %vm1112_vm1, %v1068_v54  ;;  %v1071_v60 = vmul.f32 %v1668_v26, %v2258_v25  ;;  %1689 = vpow2.f32 %v1304_v59 }
 0x14a   :  { %v1672_v48 = vpop.eup %1671  ;;  %1165 = vst.msk [vmem:[%s2657_s3 + $0x1a0] sm:$0xff] %vm1112_vm1, %v1100_v57  ;;  %v1103_v2 = vmul.f32 %v1670_v7, %v2261_v36  ;;  %1691 = vpow2.f32 %v1275_v44 }
 0x14b   :  { %v1674_v38 = vpop.eup %1673  ;;  %1136 = vst.msk [vmem:[%s2657_s3 + $0xb8] sm:$0xff] %vm1112_vm1, %v1071_v60  ;;  %v1070_v25 = vmul.f32 %v1672_v48, %v2264_v41  ;;  %1693 = vpow2.f32 %v1307_v35 }
 0x14c   :  { %v1676_v10 = vpop.eup %1675  ;;  %1168 = vst.msk [vmem:[%s2657_s3 + $0x1b8] sm:$0xff] %vm1112_vm1, %v1103_v2  ;;  %v1102_v36 = vmul.f32 %v1674_v38, %v2271_v23  ;;  %1695 = vpow2.f32 %v1274_v24 }
 0x14d   :  { %v1678_v42 = vpop.eup %1677  ;;  %1135 = vst.msk [vmem:[%s2657_s3 + $0xb0] sm:$0xff] %vm1112_vm1, %v1070_v25  ;;  %v1073_v41 = vmul.f32 %v1676_v10, %v2284_v33  ;;  %1697 = vpow2.f32 %v1306_v22 }
 0x14e   :  { %v1680_v20 = vpop.eup %1679  ;;  %1167 = vst.msk [vmem:[%s2657_s3 + $0x1b0] sm:$0xff] %vm1112_vm1, %v1102_v36  ;;  %v1105_v23 = vmul.f32 %v1678_v42, %v2287_v61  ;;  %1699 = vpow2.f32 %v1277_v17 }
 0x14f   :  { %v1682_v49 = vpop.eup %1681  ;;  %1138 = vst.msk [vmem:[%s2657_s3 + $0xc8] sm:$0xff] %vm1112_vm1, %v1073_v41  ;;  %v1072_v33 = vmul.f32 %v1680_v20, %v2290_v4  ;;  %1701 = vpow2.f32 %v1309_v28 }
 0x150   :  { %v1684_v63 = vpop.eup %1683  ;;  %1170 = vst.msk [vmem:[%s2657_s3 + $0x1c8] sm:$0xff] %vm1112_vm1, %v1105_v23  ;;  %v1104_v52 = vmul.f32 %v1682_v49, %v2296_v14  ;;  %1703 = vpow2.f32 %v1276_v39 }
 0x151   :  { %v1686_v61 = vpop.eup %1685  ;;  %1137 = vst.msk [vmem:[%s2657_s3 + $0xc0] sm:$0xff] %vm1112_vm1, %v1072_v33  ;;  %v883_v11 = vadd.f32 1.0, %v1684_v63  ;;  %1705 = vpow2.f32 %v1308_v21 }
 0x152   :  { %v1688_v0 = vpop.eup %1687  ;;  %1169 = vst.msk [vmem:[%s2657_s3 + $0x1c0] sm:$0xff] %vm1112_vm1, %v1104_v52  ;;  %v915_v4 = vadd.f32 1.0, %v1686_v61 }
 0x153   :  { %v1690_v53 = vpop.eup %1689  ;;  %1707 = vrcp.f32 %v883_v11  ;;  %v882_v18 = vadd.f32 1.0, %v1688_v0 }
 0x154   :  { %v1692_v14 = vpop.eup %1691  ;;  %1709 = vrcp.f32 %v915_v4  ;;  %v914_v55 = vadd.f32 1.0, %v1690_v53 }
 0x155   :  { %v1694_v31 = vpop.eup %1693  ;;  %1711 = vrcp.f32 %v882_v18  ;;  %v885_v46 = vadd.f32 1.0, %v1692_v14 }
 0x156   :  { %v1696_v27 = vpop.eup %1695  ;;  %1713 = vrcp.f32 %v914_v55  ;;  %v917_v40 = vadd.f32 1.0, %v1694_v31 }
 0x157   :  { %v1698_v32 = vpop.eup %1697  ;;  %1715 = vrcp.f32 %v885_v46  ;;  %v884_v6 = vadd.f32 1.0, %v1696_v27 }
 0x158   :  { %v1700_v1 = vpop.eup %1699  ;;  %1717 = vrcp.f32 %v917_v40  ;;  %v916_v34 = vadd.f32 1.0, %v1698_v32 }
 0x159   :  { %v1702_v5 = vpop.eup %1701  ;;  %1719 = vrcp.f32 %v884_v6  ;;  %v887_v30 = vadd.f32 1.0, %v1700_v1 }
 0x15a   :  { %v1704_v43 = vpop.eup %1703  ;;  %1721 = vrcp.f32 %v916_v34  ;;  %v919_v58 = vadd.f32 1.0, %v1702_v5 }
 0x15b   :  { %v1706_v13 = vpop.eup %1705  ;;  %1723 = vrcp.f32 %v887_v30  ;;  %v886_v59 = vadd.f32 1.0, %v1704_v43 }
 0x15c   :  { %1725 = vrcp.f32 %v919_v58  ;;  %v918_v62 = vadd.f32 1.0, %v1706_v13 }
 0x15d   :  { %v1708_v12 = vpop.eup %1707  ;;  %1727 = vrcp.f32 %v886_v59 }
 0x15e   :  { %v1710_v44 = vpop.eup %1709  ;;  %v1075_v37 = vmul.f32 %v1708_v12, %v2310_v29  ;;  %1729 = vrcp.f32 %v918_v62 }
 0x15f   :  { %v1712_v54 = vpop.eup %1711  ;;  %v1107_v35 = vmul.f32 %v1710_v44, %v2313_v56 }
 0x160   :  { %v1714_v26 = vpop.eup %1713  ;;  %1140 = vst.msk [vmem:[%s2657_s3 + $0xd8] sm:$0xff] %vm1112_vm1, %v1075_v37  ;;  %v1074_v57 = vmul.f32 %v1712_v54, %v2316_v8 }
 0x161   :  { %v1716_v24 = vpop.eup %1715  ;;  %1172 = vst.msk [vmem:[%s2657_s3 + $0x1d8] sm:$0xff] %vm1112_vm1, %v1107_v35  ;;  %v1106_v29 = vmul.f32 %v1714_v26, %v2324_v16 }
 0x162   :  { %v1718_v7 = vpop.eup %1717  ;;  %1139 = vst.msk [vmem:[%s2657_s3 + $0xd0] sm:$0xff] %vm1112_vm1, %v1074_v57  ;;  %v1077_v56 = vmul.f32 %v1716_v24, %v2340_v50 }
 0x163   :  { %v1720_v60 = vpop.eup %1719  ;;  %1171 = vst.msk [vmem:[%s2657_s3 + $0x1d0] sm:$0xff] %vm1112_vm1, %v1106_v29  ;;  %v1109_v8 = vmul.f32 %v1718_v7, %v2349_v19 }
 0x164   :  { %v1722_v22 = vpop.eup %1721  ;;  %1142 = vst.msk [vmem:[%s2657_s3 + $0xe8] sm:$0xff] %vm1112_vm1, %v1077_v56  ;;  %v1076_v16 = vmul.f32 %v1720_v60, %v2352_v9 }
 0x165   :  { %v1724_v48 = vpop.eup %1723  ;;  %1174 = vst.msk [vmem:[%s2657_s3 + $0x1e8] sm:$0xff] %vm1112_vm1, %v1109_v8  ;;  %v1108_v50 = vmul.f32 %v1722_v22, %v2365_v3 }
 0x166   :  { %v1726_v2 = vpop.eup %1725  ;;  %1141 = vst.msk [vmem:[%s2657_s3 + $0xe0] sm:$0xff] %vm1112_vm1, %v1076_v16  ;;  %v1079_v19 = vmul.f32 %v1724_v48, %v2386_v47 }
 0x167   :  { %v1728_v17 = vpop.eup %1727  ;;  %1173 = vst.msk [vmem:[%s2657_s3 + $0x1e0] sm:$0xff] %vm1112_vm1, %v1108_v50  ;;  %v1111_v9 = vmul.f32 %v1726_v2, %v2395_v45 }
 0x168   :  { %v1730_v38 = vpop.eup %1729  ;;  %1144 = vst.msk [vmem:[%s2657_s3 + $0xf8] sm:$0xff] %vm1112_vm1, %v1079_v19  ;;  %v1078_v3 = vmul.f32 %v1728_v17, %v2398_v15 }
 0x169   :  { %1176 = vst.msk [vmem:[%s2657_s3 + $0x1f8] sm:$0xff] %vm1112_vm1, %v1111_v9  ;;  %v1110_v47 = vmul.f32 %v1730_v38, %v2407_v51 }
 0x16a   :  { %1143 = vst.msk [vmem:[%s2657_s3 + $0xf0] sm:$0xff] %vm1112_vm1, %v1078_v3 }
 0x16b   :  { %1175 = vst.msk [vmem:[%s2657_s3 + $0x1f0] sm:$0xff] %vm1112_vm1, %v1110_v47 }

</bundles_post_ra>
